<compile_context>
chip_gen: v5e
topology: v5e:2x2
jax: 0.10.0
libtpu: 0.0.40
codegen_flags: <defaults>
</compile_context>

<pallas_src>
import jax
import jax.numpy as jnp
from jax import lax
from jax.experimental import pallas as pl
from jax.experimental.pallas import tpu as pltpu

EPS = 1e-5


def phm_weight(A, S):
    """W = sum_i kron(A_i, S_i).  A: (4,4,4), S: (4, O2//4, C//4) -> (O2, C)."""
    k = jnp.einsum("nab,npq->apbq", A, S)  # (4, O2//4, 4, C//4)
    return k.reshape(4 * S.shape[1], 4 * S.shape[2])


def _round_up(a, b):
    return ((a + b - 1) // b) * b


def _vmem_cap_bytes():
    """Physical VMEM capacity (falls back to the smallest production value)."""
    try:
        return int(pltpu.get_tpu_info().vmem_capacity_bytes)
    except Exception:
        return 64 << 20  # v7x per-TC capacity; conservative default


def _choose_pos_tile(hw, bytes_per_pos, max_tile=2048):
    """Largest lane-dense (multiple-of-128) position tile within VMEM budget.

    The tile does NOT have to divide hw: the grid uses pl.cdiv and the ragged
    tail is masked in-kernel (stats) / by Pallas boundary stores (apply).
    """
    cap = _vmem_cap_bytes()
    budget = max(8 << 20, (2 * cap) // 5)           # <= ~40% of physical VMEM
    tp = min(_round_up(hw, 128), max(128, (max_tile // 128) * 128))
    while tp > 128 and tp * bytes_per_pos > budget:
        tp = max(128, _round_up(tp // 2, 128))
    return tp


def _compiler_params(dim_semantics, block_bytes):
    """dimension_semantics + a VMEM limit sized from actual block usage,
    capped only by the device's physical capacity (minus headroom)."""
    cap = _vmem_cap_bytes()
    need = 2 * int(block_bytes) + (4 << 20)          # double-buffered + slack
    limit = int(min(max(need, 16 << 20), max(cap - (16 << 20), 16 << 20)))
    return pltpu.CompilerParams(dimension_semantics=dim_semantics,
                                vmem_limit_bytes=limit)


# ----------------------------- Pallas kernels --------------------------------


def _make_stats_kernel(hw, tp, pti):
    """Per-image channel sum + CxC Gram of X, accumulated over position tiles.

    x_ref: (1, C, TP)   s_ref: (1, C, 1)   g_ref: (1, C, C)
    Grid (N, NSPLIT, PTI); the last axis is the reduction axis ("arbitrary"),
    the first two are "parallel" (the NSPLIT axis gives v7x's second TensorCore
    work even when N == 1).  Ragged tail columns are masked to zero in-kernel.
    """
    tail = (hw % tp) != 0

    def kernel(x_ref, s_ref, g_ref):
        @pl.when(pl.program_id(2) == 0)
        def _init():
            s_ref[...] = jnp.zeros_like(s_ref)
            g_ref[...] = jnp.zeros_like(g_ref)

        xb = x_ref[0]                                   # (C, TP), native dtype
        if tail:
            t = pl.program_id(1) * pti + pl.program_id(2)   # global tile index
            pos = t * tp + lax.broadcasted_iota(jnp.int32, xb.shape, 1)
            xb = jnp.where(pos < hw, xb, jnp.zeros_like(xb))
        # f32 accumulation; matmul operands stay in the native (e.g. bf16) dtype.
        s_ref[0] += jnp.sum(xb.astype(jnp.float32), axis=1, keepdims=True)
        g_ref[0] += lax.dot_general(
            xb, xb,
            dimension_numbers=(((1,), (1,)), ((), ())),
            preferred_element_type=jnp.float32)

    return kernel


def _make_apply_kernel(compute_dtype, small_c):
    """out[n, :, tile] = W_final @ x[n, :, tile] + b_final.

    x_ref: (1, C, TP)  w_ref: (O, C)  b_ref: (O, 1)  o_ref: (1, O, TP)
    PHM projection, BN affine and the adjacent-channel pair-sum are pre-folded
    into (w_ref, b_ref).  Output stores are lane-dense (TP % 128 == 0); the
    ragged tail block is masked by Pallas on write.  The per-tile dtype cast
    happens here (no wrapper-side astype copy of the whole tensor).
    """

    def kernel(x_ref, w_ref, b_ref, o_ref):
        xb = x_ref[0]                                   # (C, TP), native dtype
        if small_c:
            # Degenerate contraction (C < 32): VPU broadcast-FMA over channels
            # instead of a K=C MXU matmul.
            xf = xb.astype(jnp.float32)
            w = w_ref[...].astype(jnp.float32)          # (O, C), tiny
            acc = jnp.zeros((w.shape[0], xf.shape[1]), jnp.float32)
            for c in range(xf.shape[0]):                # static, small C
                acc = acc + w[:, c:c + 1] * xf[c:c + 1, :]
        else:
            acc = jnp.dot(w_ref[...], xb.astype(compute_dtype),
                          preferred_element_type=jnp.float32)
        o_ref[0] = (acc + b_ref[...]).astype(o_ref.dtype)

    return kernel


# ------------------------------- wrapper --------------------------------------


def axial_attention_forward(x, params, width=False, *,
                            compute_dtype=jnp.bfloat16, max_pos_tile=2048):
    """Pallas TPU implementation of AxialAttention.forward (stride == 1 path).

    For stride == 1 the module is a per-position op over channels, so the
    width=True and width=False branches produce the identical
    (N, out_planes, H, W) output; `width` is accepted for API parity only.
    x is read directly in NCHW (viewed as (N, C, H*W)) — no wrapper transposes,
    pads, casts or output slices.

    compute_dtype: MXU operand dtype for the streamed apply matmul (bf16
    recommended on v5e/v6e/v7x; pass jnp.float32 for exact f32 numerics).
    Statistics and accumulation are always f32.
    """
    del width  # Both branches compute the same result for stride == 1.

    A, S = params["A"], params["S"]
    gamma = params["gamma"].astype(jnp.float32)
    beta = params["beta"].astype(jnp.float32)
    # params["bias"] (the PHM bias) cancels exactly under training-mode BN
    # (y - mean_y = W(x - mu)); it only affects the un-modeled running stats.

    N, C, H, W = x.shape
    O2 = 4 * S.shape[1]
    O = O2 // 2
    HW = H * W
    M = N * HW                    # BatchNorm statistics run over all positions

    in_itemsize = jnp.dtype(x.dtype).itemsize
    cd_itemsize = jnp.dtype(compute_dtype).itemsize
    out_itemsize = in_itemsize
    small_c = C < 32

    # Per-position VMEM bytes across double-buffered blocks of both passes.
    bytes_per_pos = 2 * (C * (in_itemsize + cd_itemsize) + O * (out_itemsize + 4))
    TP = _choose_pos_tile(HW, bytes_per_pos, max_pos_tile)
    PT = pl.cdiv(HW, TP)
    NSPLIT = 2 if (PT >= 2 and PT % 2 == 0) else 1   # megacore split of stats
    PTI = PT // NSPLIT

    x3 = x.reshape(N, C, HW)      # free reshape; read directly, no pad/astype

    # ---- Pass 1: per-image channel sum + C x C Gram of X --------------------
    stats_block_bytes = C * TP * in_itemsize + C * 4 + C * C * 4
    stats_cost = pl.CostEstimate(
        flops=2 * N * HW * C * C + N * HW * C,
        transcendentals=0,
        bytes_accessed=N * C * HW * in_itemsize + N * NSPLIT * C * (C + 1) * 4)
    s_part, g_part = pl.pallas_call(
        _make_stats_kernel(HW, TP, PTI),
        out_shape=(
            jax.ShapeDtypeStruct((N * NSPLIT, C, 1), jnp.float32),
            jax.ShapeDtypeStruct((N * NSPLIT, C, C), jnp.float32),
        ),
        grid=(N, NSPLIT, PTI),
        in_specs=[pl.BlockSpec((1, C, TP),
                               lambda n, s, p: (n, 0, s * PTI + p))],
        out_specs=(
            pl.BlockSpec((1, C, 1), lambda n, s, p: (n * NSPLIT + s, 0, 0)),
            pl.BlockSpec((1, C, C), lambda n, s, p: (n * NSPLIT + s, 0, 0)),
        ),
        compiler_params=_compiler_params(("parallel", "parallel", "arbitrary"),
                                         stats_block_bytes),
        cost_estimate=stats_cost,
    )(x3)

    # ---- Fold: analytic BN statistics + affine + pair-sum -> (O, C) weight ---
    sum_x = s_part.sum(axis=0)[:, 0]                 # (C,)
    gram = g_part.sum(axis=0)                        # (C, C), hierarchical f32
    mean_x = sum_x / M
    cov_x = gram / M - jnp.outer(mean_x, mean_x)     # biased covariance

    w_phm = phm_weight(A, S).astype(jnp.float32)     # (O2, C)
    proj_mean = w_phm @ mean_x                       # E[W x]  (bias cancels)
    var_y = jnp.einsum("oc,cd,od->o", w_phm, cov_x, w_phm)   # biased, like BN
    var_y = jnp.maximum(var_y, 0.0)                  # guard f32 cancellation
    rstd = lax.rsqrt(var_y + EPS)
    scale = gamma * rstd                             # (O2,)
    shift = beta - scale * proj_mean                 # (O2,)  [PHM bias cancels]
    # Fold BN affine and the adjacent-channel pair-sum (.view(...,2,.).sum(-2))
    # into one weight/bias: pass 2 becomes a single streamed matmul.
    w_final = (w_phm * scale[:, None]).reshape(O, 2, C).sum(axis=1)  # (O, C)
    b_final = shift.reshape(O, 2).sum(axis=1)                        # (O,)

    # ---- Pass 2: streamed matmul  out[n] = W_final @ x[n] + b_final ----------
    wc = w_final.astype(compute_dtype)               # tiny; VMEM-resident
    bc = b_final.reshape(O, 1).astype(jnp.float32)

    apply_block_bytes = (C * TP * (in_itemsize + cd_itemsize)
                         + O * C * cd_itemsize + O * 4 + O * TP * out_itemsize)
    apply_cost = pl.CostEstimate(
        flops=2 * N * HW * C * O,
        transcendentals=0,
        bytes_accessed=(N * C * HW * in_itemsize + O * C * cd_itemsize
                        + N * O * HW * out_itemsize))
    out3 = pl.pallas_call(
        _make_apply_kernel(compute_dtype, small_c),
        out_shape=jax.ShapeDtypeStruct((N, O, HW), x.dtype),
        grid=(N, PT),
        in_specs=[
            pl.BlockSpec((1, C, TP), lambda n, p: (n, 0, p)),
            pl.BlockSpec((O, C), lambda n, p: (0, 0)),   # tiny, VMEM-resident
            pl.BlockSpec((O, 1), lambda n, p: (0, 0)),   # tiny, VMEM-resident
        ],
        out_specs=pl.BlockSpec((1, O, TP), lambda n, p: (n, 0, p)),
        compiler_params=_compiler_params(("parallel", "parallel"),
                                         apply_block_bytes),
        cost_estimate=apply_cost,
    )(x3, wc, bc)

    return out3.reshape(N, O, H, W)                  # free reshape


# ------------------------------ pure-JAX reference ----------------------------


def axial_attention_reference(x, params, width=False):
    """Pure-JAX reference (faithful to the module's permute/view path)."""
    A, S = params["A"], params["S"]
    bias, gamma, beta = params["bias"], params["gamma"], params["beta"]
    O2 = 4 * S.shape[1]
    O = O2 // 2

    if width:
        xp = jnp.transpose(x, (0, 2, 1, 3))
    else:
        xp = jnp.transpose(x, (0, 3, 1, 2))
    Nn, Wn, Cn, Hn = xp.shape
    x3 = xp.reshape(Nn * Wn, Cn, Hn)

    w_phm = phm_weight(A, S)  # (O2, C)
    y = jnp.einsum("oc,bch->boh", w_phm, x3) + bias[None, :, None]

    mean = jnp.mean(y, axis=(0, 2), keepdims=True)
    var = jnp.mean(jnp.square(y - mean), axis=(0, 2), keepdims=True)
    yn = (y - mean) * jax.lax.rsqrt(var + EPS)
    yn = yn * gamma[None, :, None] + beta[None, :, None]

    out = yn.reshape(Nn, Wn, O, 2, Hn).sum(axis=-2)  # (N, W, O, H)
    if width:
        out = jnp.transpose(out, (0, 2, 1, 3))
    else:
        out = jnp.transpose(out, (0, 2, 3, 1))
    return out


# ------------------------------------ demo ------------------------------------


def _make_params(key, in_planes, out_planes):
    O2 = out_planes * 2
    kA, kS, kb, kg, kbeta = jax.random.split(key, 5)
    return {
        "A": jax.random.normal(kA, (4, 4, 4), dtype=jnp.float32) * 0.5,
        "S": jax.random.normal(kS, (4, O2 // 4, in_planes // 4),
                               dtype=jnp.float32) * 0.5,
        "bias": jax.random.normal(kb, (O2,), dtype=jnp.float32) * 0.1,
        "gamma": 1.0 + 0.1 * jax.random.normal(kg, (O2,), dtype=jnp.float32),
        "beta": 0.1 * jax.random.normal(kbeta, (O2,), dtype=jnp.float32),
    }


if __name__ == "__main__":
    key = jax.random.PRNGKey(0)
    k1, k2, k3, k4 = jax.random.split(key, 4)

    # --- Test A: module-sized example (C=4 -> small-C VPU path) ---------------
    N, C, H, W = 2, 4, 16, 16
    out_planes = 8
    x = jax.random.normal(k1, (N, C, H, W), dtype=jnp.float32)
    params = _make_params(k2, C, out_planes)
    ref = axial_attention_reference(x, params, width=False)

    out_f32 = jax.block_until_ready(
        axial_attention_forward(x, params, width=False,
                                compute_dtype=jnp.float32))
    assert out_f32.shape == (N, out_planes, H, W), out_f32.shape
    assert jnp.allclose(out_f32, ref, atol=1e-3, rtol=1e-3), float(
        jnp.max(jnp.abs(out_f32 - ref)))

    out_bf16 = jax.block_until_ready(
        axial_attention_forward(x, params, width=False))
    assert jnp.allclose(out_bf16, ref, atol=5e-2, rtol=5e-2), float(
        jnp.max(jnp.abs(out_bf16 - ref)))

    out_w = jax.block_until_ready(
        axial_attention_forward(x, params, width=True))
    ref_w = axial_attention_reference(x, params, width=True)
    assert jnp.allclose(out_w, ref_w, atol=5e-2, rtol=5e-2), float(
        jnp.max(jnp.abs(out_w - ref_w)))

    # --- Test B: C=64 (MXU path) with ragged spatial (HW=224, masked tail) ----
    Nb, Cb, Hb, Wb = 2, 64, 16, 14
    xb = jax.random.normal(k3, (Nb, Cb, Hb, Wb), dtype=jnp.float32)
    params_b = _make_params(k4, Cb, 8)
    ref_b = axial_attention_reference(xb, params_b, width=False)
    out_b = jax.block_until_ready(
        axial_attention_forward(xb, params_b, width=False,
                                compute_dtype=jnp.float32))
    assert jnp.allclose(out_b, ref_b, atol=2e-3, rtol=2e-3), float(
        jnp.max(jnp.abs(out_b - ref_b)))
    out_b16 = jax.block_until_ready(
        axial_attention_forward(xb, params_b, width=False))
    assert jnp.allclose(out_b16, ref_b, atol=5e-2, rtol=5e-2), float(
        jnp.max(jnp.abs(out_b16 - ref_b)))

    # --- Test C: small forced tile (multi-tile grid + parallel stats split) ---
    Nc, Cc, Hc, Wc = 2, 64, 16, 32
    xc = jax.random.normal(k3, (Nc, Cc, Hc, Wc), dtype=jnp.float32)
    ref_c = axial_attention_reference(xc, params_b, width=False)
    out_c = jax.block_until_ready(
        axial_attention_forward(xc, params_b, width=False,
                                compute_dtype=jnp.float32, max_pos_tile=128))
    assert jnp.allclose(out_c, ref_c, atol=2e-3, rtol=2e-3), float(
        jnp.max(jnp.abs(out_c - ref_c)))

    print("KERNEL_OK")
</pallas_src>

<mosaic_0001>
module attributes {stable_mosaic.version = 11 : i64} {
  func.func @kernel(%arg0: i32, %arg1: i32, %arg2: i32, %arg3: memref<1x4x256xf32, #tpu.memory_space<vmem>>, %arg4: memref<1x4x1xf32, #tpu.memory_space<vmem>>, %arg5: memref<1x4x4xf32, #tpu.memory_space<vmem>>) attributes {dimension_semantics = [#tpu.dimension_semantics<parallel>, #tpu.dimension_semantics<parallel>, #tpu.dimension_semantics<arbitrary>], iteration_bounds = array<i64: 2, 1, 1>, scalar_prefetch = 0 : i64, scratch_operands = 0 : i64, tpu.core_type = #tpu.core_type<tc>, window_params = [{transform_indices = @transform_0, window_bounds = array<i64: 1, 4, 256>}, {transform_indices = @transform_1, window_bounds = array<i64: 1, 4, 1>}, {transform_indices = @transform_2, window_bounds = array<i64: 1, 4, 4>}]} {
    %c0_i32 = arith.constant 0 : i32
    %0 = arith.cmpi eq, %arg2, %c0_i32 : i32
    %1 = arith.extui %0 : i1 to i32
    %c0_i32_0 = arith.constant 0 : i32
    %2 = arith.cmpi ne, %1, %c0_i32_0 : i32
    scf.if %2 {
      %cst_16 = arith.constant 0.000000e+00 : f32
      %20 = vector.broadcast %cst_16 : f32 to vector<1x4x1xf32>
      %c0_17 = arith.constant 0 : index
      %c0_18 = arith.constant 0 : index
      %c0_19 = arith.constant 0 : index
      %21 = vector.load %arg4[%c0_17, %c0_18, %c0_19] : memref<1x4x1xf32, #tpu.memory_space<vmem>>, vector<1x4x1xf32>
      tpu.vector_store %arg4[%c0_17, %c0_18, %c0_19], %20 {strides = array<i32>} : memref<1x4x1xf32, #tpu.memory_space<vmem>>, vector<1x4x1xf32>,
      %cst_20 = arith.constant 0.000000e+00 : f32
      %22 = vector.broadcast %cst_20 : f32 to vector<1x4x4xf32>
      %c0_21 = arith.constant 0 : index
      %c0_22 = arith.constant 0 : index
      %c0_23 = arith.constant 0 : index
      %23 = vector.load %arg5[%c0_21, %c0_22, %c0_23] : memref<1x4x4xf32, #tpu.memory_space<vmem>>, vector<1x4x4xf32>
      tpu.vector_store %arg5[%c0_21, %c0_22, %c0_23], %22 {strides = array<i32>} : memref<1x4x4xf32, #tpu.memory_space<vmem>>, vector<1x4x4xf32>,
    } else {
    }
    %c0 = arith.constant 0 : index
    %c0_1 = arith.constant 0 : index
    %c0_2 = arith.constant 0 : index
    %3 = vector.load %arg3[%c0, %c0_1, %c0_2] : memref<1x4x256xf32, #tpu.memory_space<vmem>>, vector<1x4x256xf32>
    %4 = vector.shape_cast %3 : vector<1x4x256xf32> to vector<4x256xf32>
    %c0_3 = arith.constant 0 : index
    %c0_4 = arith.constant 0 : index
    %c0_5 = arith.constant 0 : index
    %5 = vector.load %arg4[%c0_3, %c0_4, %c0_5] : memref<1x4x1xf32, #tpu.memory_space<vmem>>, vector<1x4x1xf32>
    %6 = vector.shape_cast %5 : vector<1x4x1xf32> to vector<4x1xf32>
    %cst = arith.constant dense<0.000000e+00> : vector<4xf32>
    %7 = vector.multi_reduction <add>, %4, %cst [1] : vector<4x256xf32> to vector<4xf32>
    %8 = vector.shape_cast %7 : vector<4xf32> to vector<4x1xf32>
    %9 = arith.addf %6, %8 : vector<4x1xf32>
    %c0_6 = arith.constant 0 : index
    %c0_7 = arith.constant 0 : index
    %c0_8 = arith.constant 0 : index
    %10 = vector.load %arg4[%c0_6, %c0_7, %c0_8] : memref<1x4x1xf32, #tpu.memory_space<vmem>>, vector<1x4x1xf32>
    %11 = vector.shape_cast %10 : vector<1x4x1xf32> to vector<4x1xf32>
    %12 = vector.shape_cast %9 : vector<4x1xf32> to vector<1x4x1xf32>
    tpu.vector_store %arg4[%c0_6, %c0_7, %c0_8], %12 {strides = array<i32>} : memref<1x4x1xf32, #tpu.memory_space<vmem>>, vector<1x4x1xf32>,
    %c0_9 = arith.constant 0 : index
    %c0_10 = arith.constant 0 : index
    %c0_11 = arith.constant 0 : index
    %13 = vector.load %arg5[%c0_9, %c0_10, %c0_11] : memref<1x4x4xf32, #tpu.memory_space<vmem>>, vector<1x4x4xf32>
    %14 = vector.shape_cast %13 : vector<1x4x4xf32> to vector<4x4xf32>
    %cst_12 = arith.constant dense<0.000000e+00> : vector<4x4xf32>
    %15 = tpu.matmul %4, %4, %cst_12 {dimension_numbers = #tpu.dot_dimension_numbers<[1], [1], [0], [0], [0, 0, 1, 0], [], []>} : vector<4x256xf32>, vector<4x256xf32>, vector<4x4xf32> -> vector<4x4xf32>
    %16 = arith.addf %14, %15 : vector<4x4xf32>
    %c0_13 = arith.constant 0 : index
    %c0_14 = arith.constant 0 : index
    %c0_15 = arith.constant 0 : index
    %17 = vector.load %arg5[%c0_13, %c0_14, %c0_15] : memref<1x4x4xf32, #tpu.memory_space<vmem>>, vector<1x4x4xf32>
    %18 = vector.shape_cast %17 : vector<1x4x4xf32> to vector<4x4xf32>
    %19 = vector.shape_cast %16 : vector<4x4xf32> to vector<1x4x4xf32>
    tpu.vector_store %arg5[%c0_13, %c0_14, %c0_15], %19 {strides = array<i32>} : memref<1x4x4xf32, #tpu.memory_space<vmem>>, vector<1x4x4xf32>,
    return
  }
  func.func @transform_0(%arg0: i32, %arg1: i32, %arg2: i32) -> (i32, i32, i32) {
    %c1_i32 = arith.constant 1 : i32
    %0 = arith.muli %arg1, %c1_i32 : i32
    %1 = arith.addi %0, %arg2 : i32
    %c0_i32 = arith.constant 0 : i32
    %c0_i32_0 = arith.constant 0 : i32
    return %arg0, %c0_i32, %1 : i32, i32, i32
  }
  func.func @transform_1(%arg0: i32, %arg1: i32, %arg2: i32) -> (i32, i32, i32) {
    %c1_i32 = arith.constant 1 : i32
    %0 = arith.muli %arg0, %c1_i32 : i32
    %1 = arith.addi %0, %arg1 : i32
    %c0_i32 = arith.constant 0 : i32
    %c0_i32_0 = arith.constant 0 : i32
    %c0_i32_1 = arith.constant 0 : i32
    return %1, %c0_i32, %c0_i32_0 : i32, i32, i32
  }
  func.func @transform_2(%arg0: i32, %arg1: i32, %arg2: i32) -> (i32, i32, i32) {
    %c1_i32 = arith.constant 1 : i32
    %0 = arith.muli %arg0, %c1_i32 : i32
    %1 = arith.addi %0, %arg1 : i32
    %c0_i32 = arith.constant 0 : i32
    %c0_i32_0 = arith.constant 0 : i32
    %c0_i32_1 = arith.constant 0 : i32
    return %1, %c0_i32, %c0_i32_0 : i32, i32, i32
  }
}

</mosaic_0001>

<bundles_post_ra>
// kernel: tpu_custom_call.1
= control target key start
LH: loop header
LB: loop body
LE: loop exit
PB: predicated region body
PF: predicated region fallthrough
CT: control target
= control target key end

     0   :  { %8 = vsyncpa [#allocation3], 0  ;;  %s762_s0 = inlined_call_operand.hbm [shape: f32[2,4,256], index: 0, kind: input, shape index: {}]   ;;  %s763_s1 = inlined_call_operand.vmem [shape: f32[2,4,1], index: 1, kind: output, shape index: {0}]   ;;  %s764_s2 = inlined_call_operand.hbm [shape: f32[2,4,4], index: 2, kind: output, shape index: {1}]  }
   0x1   :  { %10 = vsyncpa [#allocation3 + $0x1], 0 }
   0x2   :  { %11 = vsyncpa [#allocation4], 0 }
   0x3   :  { %13 = vsyncpa [#allocation4 + $0x1], 0  ;;  %s634_s9 = smov 0   ;;  %s636_s10 = smov 0  }
   0x4   :  { %s638_s11 = smov 0   ;;  %s640_s12 = smov 0  }
   0x5   :  { %s642_s13 = smov 0   ;;  %s644_s14 = smov 0  }
   0x6 LB: > { %s425_s15 = sadd.s32 4294967295, %s616_s14   ;;  %s426_s16 = sadd.s32 4294967294, %s616_s14   ;;  %s616_s14 = sphi %s644_s14, %s19_s14   ;;  %s612_s13 = sphi %s642_s13, %s773_s13   ;;  %s608_s12 = sphi %s640_s12, %s772_s12   ;;  %s604_s11 = sphi %s638_s11, %s771_s11   ;;  %s600_s10 = sphi %s636_s10, %s770_s10   ;;  %s596_s9 = sphi %s634_s9, %s769_s9  }
   0x7   : > { %s38_s17 = sadd.s32 1, %s612_s13  ;;  %s49_s18 = sadd.s32 1, %s604_s11 }
   0x8   : > { %p40_p0 = scmp.ge.s32.totalorder %s38_s17, 2  ;;  %p56_p1 = scmp.ne.s32.totalorder %s604_s11, %s600_s10 }
   0x9   : > { %p57_p2 = scmp.eq.s32.totalorder %s616_s14, 0  ;;  %p62_p3 = scmp.ne.s32.totalorder %s600_s10, %s596_s9 }
   0xa   : > { %s775_s17 = smov (%p40_p0, %s38_s17), 0  ;;  %p63_p5 = scmp.eq.s32.totalorder %s425_s15, 0 }
   0xb   : > { %p675_p4 = por %p57_p2, %p56_p1  ;;  %s44_s20 = ssub.s32 %s612_s13, %s775_s17 }
   0xc   : > { %p116_p6 = scmp.eq.s32.totalorder %s425_s15, 1  ;;  %p47_p7 = scmp.eq.s32.totalorder %s44_s20, 0 }
   0xd   : > { %p681_p8 = por %p63_p5, %p62_p3  ;;  %p122_p10 = scmp.eq.s32.totalorder %s426_s16, 1 }
   0xe   : > { %p685_p9 = por %p116_p6, %p56_p1  ;;  %p428_p12 = scmp.ge.s32.totalorder %s616_s14, 2 }
   0xf   : > { %s690_s23 = scalar_select %p47_p7, %s604_s11, %s49_s18  }
  0x10   : > { %p692_p11 = por %p122_p10, %p62_p3  ;;  %p453_p13 = scmp.lt.s32.totalorder %s616_s14, 2 }
  0x11   : > { %s142_s25 = sand.u32 1, %s604_s11   ;;  %s440_s27 = sshll.u32 %s612_s13, 3 }
  0x12   : > { %s429_s26 = sshll.u32 %s142_s25, 3  ;;  %s154_s30 = scalar_lea.hbm %s762_s0, %s440_s27 }
  0x13   : > { %s146_s3 = scalar_lea.vmem [#allocation2], %s429_s26  ;;  %s156_s5 = sshll.u32 %s154_s30, 4  ;;  %s157_s5 = int_to_ptr.hbm [resolvable:$true] %s156_s5 }
  0x14   : > { %s158_s4 = sshll.u32 %s146_s3, 4  ;;  %p446_p0 = pnand %p453_p13, %p675_p4  ;;  %s159_s4 = int_to_ptr.vmem [resolvable:$true] %s158_s4 }
  0x15   : > { %p432_p1 = scmp.ge.s32.totalorder %s616_s14, 1  ;;  %p163_p2 = scmp.lt.s32.totalorder %s616_s14, 3 }
  0x16   : > { %s143_s6 = scalar_lea.sflag [#allocation3], %s142_s25 }
  0x17   : > { %448 = dma.hbm_to_vmem [thread:$0]  (!%p446_p0), %s157_s5, 128, %s159_s4, %s143_s6  }
  0x18   : > { %p164_p3 = pnand %p432_p1, %p163_p2 }
  0x19   : > { %s708_s7 = sand.u32 (!%p164_p3), 1, %s600_s10  }
  0x1a   : > { %167 = sbr.rel (%p164_p3) target bundleno = 193 (0xc1), region = 24  ;;  %s433_s8 = sshll.u32 (!%p164_p3), %s708_s7, 3 }
  0x1b   : > { %s170_s15 = scalar_lea.sflag (!%p164_p3), [#allocation3], %s708_s7  ;;  %s173_s16 = scalar_lea.vmem (!%p164_p3), [#allocation2], %s433_s8 }
  0x1f   : > { %587 = dma.done.wait (%p681_p8), %s170_s15, 128  }
  0x20   : > { %589 = vsyncadd (%p681_p8), %s170_s15, 4294967168  ;;  %v217_v0 = vld [vmem:[%s173_s16] sm:$0xff]  ;;  %vm225_vm0 = vcmask 1043456   ;;  %p203_p4 = scmp.lt.s32.totalorder %s608_s12, 1  ;;  %s434_s19 = sshll.u32 %s708_s7, 2  ;;  %vm215_vm1 = vcmask 27648  }
  0x21   : > { %220 = vst [vmem:[#allocation1] ss:$2 sm:$0xff] %v217_v0  ;;  %s199_s27 = scalar_lea.vmem [#allocation5], %s434_s19  ;;  %v618_v10 = vmov 0.0   ;;  %vm213_vm2 = vcmask 3072   ;;  %s437_s28 = sshll.u32 %s608_s12, 2 }
  0x22   : > { %s204_s18 = scalar_select %p203_p4, %s608_s12, 1  ;;  %216 = vst.msk [vmem:[%s199_s27] sm:$0xf] %vm215_vm1, %v618_v10 }
  0x23   : > { %s309_s3 = scalar_lea.hbm %s764_s2, %s437_s28  ;;  %s311_s4 = sshll.u32 %s199_s27, 4  ;;  %s312_s4 = int_to_ptr.vmem [resolvable:$true] %s311_s4 }
  0x24   : > { %s435_s20 = sshll.u32 %s204_s18, 2  ;;  %s313_s5 = sshll.u32 %s309_s3, 4  ;;  %s314_s5 = int_to_ptr.hbm [resolvable:$true] %s313_s5 }
  0x25   : > { %s206_s26 = scalar_lea.vmem %s763_s1, %s435_s20  ;;  %s294_s6 = scalar_lea.sflag [#allocation4], %s708_s7 }
  0x26   : > { %214 = vst.msk [vmem:[%s206_s26] sm:$0xf] %vm213_vm2, %v618_v10  ;;  %s548_s8 = sshra.s32 %s314_s5, 4  ;;  %s554_s18 = scalar_lea.hbm %s764_s2, 8  ;;  %s549_s8 = int_to_ptr.hbm [resolvable:$true] %s548_s8 }
  0x27   : > { %s550_s12 = scalar_lea.hbm %s549_s8, 4  ;;  %p555_p8 = scmp.lt.s32.totalorder %s549_s8, %s764_s2 }
  0x28   : > { %v221_v1 = vld.sshfl [vmem:[#allocation1] sm:$0xff pattern:$0x75316420]  ;;  %v222_v2 = vld.sshfl [vmem:[#allocation1 + $0x8] sm:$0xff pattern:$0x75316420]  ;;  %p551_p5 = scmp.ne.s32.totalorder %s549_s8, %s550_s12  ;;  %p556_p10 = scmp.lt.s32.totalorder %s554_s18, %s550_s12 }
  0x29   : > { %235 = vst [vmem:[#allocation1] ss:$2 sm:$0xff] %v217_v0  ;;  %v226_v3 = vsel %vm225_vm0, %v221_v1, 0.0  ;;  %v227_v4 = vsel %vm225_vm0, %v222_v2, 0.0  ;;  %v234_v15 = vld [vmem:[%s199_s27] sm:$0xf] }
  0x2a   : > { %v228_v5 = vadd.f32 %v227_v4, %v226_v3  ;;  %p552_p6 = pnand %p551_p5, %p685_p9  ;;  %p557_p13 = por %p556_p10, %p555_p8 }
  0x2c   : > { %229 = vadd.xlane.f32.xlu0 %v228_v5  ;;  %p553_p7 = pneg %p552_p6 }
  0x2d   : > { %v218_v11 = vld [vmem:[%s206_s26] sm:$0xf] }
  0x2e   : > { %p558_p0 = pnand %p557_p13, %p553_p7 }
  0x30   : > { %v236_v6 = vld.sshfl [vmem:[#allocation1] sm:$0xff pattern:$0x75316420]  ;;  %v237_v7 = vld.sshfl [vmem:[#allocation1 + $0x8] sm:$0xff pattern:$0x75316420] }
  0x31   : > { %240 = vst [vmem:[#allocation1] ss:$2 sm:$0xff] %v217_v0 }
  0x38   : > { %v241_v8 = vld.sshfl [vmem:[#allocation1] sm:$0xff pattern:$0x75316420]  ;;  %v242_v9 = vld.sshfl [vmem:[#allocation1 + $0x8] sm:$0xff pattern:$0x75316420] }
  0x39   : > { %260 = vmatpush.xpose.msra.mxu0 %v241_v8  ;;  %280 = vmatpush.xpose.msra.mxu1 %v242_v9 }
  0x3c   : > { %261 = vmatmul.f32.vlgmr.msra.gmra.mxu0 %v236_v6  ;;  %281 = vmatmul.f32.vlgmr.msra.gmra.mxu1 %v237_v7 }
  0x9f   : > { %v230_v12 = vpop.xlane.xlu0 %229 }
  0xa0   : > { %v231_v13 = vadd.f32 %v230_v12, %v218_v11 }
  0xa2   : > { %233 = vst.msk [vmem:[%s206_s26] sm:$0xf] %vm213_vm2, %v231_v13 }
  0xb9   : > { %v262_v14 = vpop.f32.mrf.mxu0  ;;  %v282_v16 = vpop.f32.mrf.mxu1 }
  0xba   : > { %v283_v17 = vadd.f32 %v282_v16, %v262_v14 }
  0xbc   : > { %v285_v18 = vadd.f32 %v283_v17, %v234_v15 }
  0xbe   : > { %287 = vst.msk [vmem:[%s199_s27] sm:$0xf] %vm215_vm1, %v285_v18 }
  0xbf   : > { %561 = shalt.err (!%p558_p0)
}
  0xc0   : > { %443 = dma.vmem_to_hbm [thread:$0]  (%p685_p9), %s312_s4, 64, %s314_s5, %s294_s6  }
  0xc1 PF: > { %s333_s7 = sand.u32 1, %s596_s9   ;;  %p450_p1 = pnand %p428_p12, %p692_p11 }
  0xc2   : > { %s334_s21 = scalar_lea.sflag [#allocation4], %s333_s7 }
  0xc3   : > { %p451_p2 = pneg %p450_p1 }
  0xc5   : > { %591 = dma.done.wait (%p451_p2), %s334_s21, 64  }
  0xc6   : > { %593 = vsyncadd (%p451_p2), %s334_s21, 4294967232  ;;  %s19_s14 = sadd.s32 1, %s616_s14   ;;  %s769_s9 = smov %s600_s10 }
  0xc7   : > { %p16_p3 = scmp.ge.s32.totalorder %s19_s14, 4   ;;  %s770_s10 = smov %s604_s11 }
  0xc8   : > { %s771_s11 = smov %s690_s23  ;;  %s772_s12 = smov %s612_s13 }
  0xc9   : > { %s773_s13 = smov %s775_s17  ;;  %18 = sbr.rel (!%p16_p3) target bundleno = 6 (0x6), region = 85 }
  0xce   :  { %340 = vsyncpa [#allocation3], 1 }
  0xcf   :  { %342 = vsyncpa [#allocation3 + $0x1], 1 }
  0xd0   :  { %343 = vsyncpa [#allocation4], 1 }
  0xd1   :  { %345 = vsyncpa [#allocation4 + $0x1], 1 }

</bundles_post_ra>
